<compile_context>
chip_gen: v7x
topology: tpu7x:2x2x1
jax: 0.10.0
libtpu: 0.0.40
codegen_flags: <defaults>
</compile_context>

<pallas_src>
import jax
import jax.numpy as jnp
from jax.experimental import pallas as pl
from jax.experimental.pallas import tpu as pltpu


def bi_lstm_kernel(x2_ref, wx_ref, wh_ref, b_ref, out_ref, xg_ref):
    L, H2 = x2_ref.shape          # (L, 2H): [emb | emb_reversed]
    H = H2 // 2

    # Recurrent weights loaded once (hoisted out of the time loop).
    wh = wh_ref[...]              # (2H, 8H) block-diag per gate: [fwd | bwd]

    # Hoisted input-side contribution for all timesteps of both directions:
    # one batched (L,2H)@(2H,8H) matmul + bias, stored to a VMEM scratch slab.
    xg_ref[...] = (jnp.dot(x2_ref[...], wx_ref[...],
                           preferred_element_type=jnp.float32)
                   + b_ref[...])                                  # (L, 8H)

    def body(t, carry):
        h, c = carry                                              # (1, 2H) each: [fwd | bwd]
        # Single fused recurrent matmul for BOTH directions: (1,2H)@(2H,8H).
        gates = (xg_ref[pl.ds(t, 1), :]
                 + jnp.dot(h, wh, preferred_element_type=jnp.float32))  # (1, 8H)
        # Gate layout (gate-major, direction-interleaved):
        #   [ i_f i_b | o_f o_b | f_f f_b | g_f g_b ]
        sig = jax.nn.sigmoid(gates)            # full-width EUP op covers i, o, f
        i_g = sig[:, 0 * H:2 * H]
        o_g = sig[:, 2 * H:4 * H]
        f_g = sig[:, 4 * H:6 * H]
        g_g = jnp.tanh(gates[:, 6 * H:8 * H])  # cell gate, one 2H-wide tanh
        c_new = f_g * c + i_g * g_g            # (1, 2H) = [cf | cb]
        h_new = o_g * jnp.tanh(c_new)          # (1, 2H) = [hf | hb]
        # One unmasked 128-lane store per step: [hf | hb | cf | cb].
        out_ref[pl.ds(t, 1), :] = jnp.concatenate([h_new, c_new], axis=1)
        return h_new, c_new

    zeros = jnp.zeros((1, 2 * H), jnp.float32)
    jax.lax.fori_loop(0, L, body, (zeros, zeros), unroll=True)


def encoder_forward(tokens, params, hidden_size):
    H = hidden_size
    L = tokens.shape[0]

    # Embedding Linear applied to a one-hot row == row gather of w_emb plus bias.
    emb = params["w_emb"][tokens] + params["b_emb"]               # (L, H), f32
    # TODO(synk): nn.Dropout in the surrounding encoder treated as identity (inference).

    # Pack forward / reversed inputs side-by-side along lanes: (L, 2H).
    x2 = jnp.concatenate([emb, emb[::-1]], axis=1)

    # Fuse the 4 per-gate Linears of BOTH directions into block-diagonal
    # matrices (2H, 8H), columns ordered gate-major / direction-interleaved,
    # so packed state [hf|hb] / packed input [emb|emb_rev] hit the right gates.
    def fuse_bidir(w_r, b_r, w_l, b_l):
        Z = jnp.zeros((H, H), jnp.float32)
        wx_cols, wh_cols, b_cols = [], [], []
        for k in range(4):                    # gate order: input, output, forget, cell
            wx_cols.append(jnp.concatenate([
                jnp.concatenate([w_r[k, :H, :], Z], axis=0),      # fwd emb rows
                jnp.concatenate([Z, w_l[k, :H, :]], axis=0),      # bwd emb rows
            ], axis=1))
            wh_cols.append(jnp.concatenate([
                jnp.concatenate([w_r[k, H:, :], Z], axis=0),      # fwd hidden rows
                jnp.concatenate([Z, w_l[k, H:, :]], axis=0),      # bwd hidden rows
            ], axis=1))
            b_cols.append(jnp.concatenate([b_r[k], b_l[k]], axis=1))
        return (jnp.concatenate(wx_cols, axis=1),                 # (2H, 8H)
                jnp.concatenate(wh_cols, axis=1),                 # (2H, 8H)
                jnp.concatenate(b_cols, axis=1))                  # (1, 8H)

    wx_blk, wh_blk, b_blk = fuse_bidir(params["w_r"], params["b_r"],
                                       params["w_l"], params["b_l"])

    def full(shape):
        return pl.BlockSpec(shape, lambda i: (0,) * len(shape))

    grid_spec = pltpu.PrefetchScalarGridSpec(
        num_scalar_prefetch=0,
        grid=(1,),                                # single grid point: loop is in-kernel
        in_specs=[
            full((L, 2 * H)),                     # packed inputs [emb | emb_rev]
            full((2 * H, 8 * H)),                 # fused x-side weights
            full((2 * H, 8 * H)),                 # fused recurrent weights
            full((1, 8 * H)),                     # fused bias
        ],
        out_specs=full((L, 4 * H)),               # per step [hf | hb | cf | cb]
        scratch_shapes=[pltpu.VMEM((L, 8 * H), jnp.float32)],   # hoisted x@Wx slab
    )

    out = pl.pallas_call(
        bi_lstm_kernel,
        out_shape=jax.ShapeDtypeStruct((L, 4 * H), jnp.float32),
        grid_spec=grid_spec,
        compiler_params=pltpu.CompilerParams(dimension_semantics=("arbitrary",)),
    )(x2, wx_blk, wh_blk, b_blk)

    # Wrapper-side split (pure layout plumbing, matches the original layout).
    h_out = out[:, None, 0:2 * H]                 # (L, 1, 2H) = concat(fwd_h, bwd_h)
    c_out = out[:, None, 2 * H:4 * H]             # (L, 1, 2H) = concat(fwd_c, bwd_c)
    return h_out, c_out


def reference_forward(tokens, params, H):
    """Pure-JAX replica of the PyTorch forward (unfused per-gate weights, dropout = identity)."""
    V = params["w_emb"].shape[0]
    oh = jax.nn.one_hot(tokens, V, dtype=jnp.float32)[:, None, :]  # (L, 1, V)

    def run(seq, w, b):
        h = jnp.zeros((1, H), jnp.float32)
        c = jnp.zeros((1, H), jnp.float32)
        hs, cs = [], []
        for t in range(seq.shape[0]):
            emb = seq[t] @ params["w_emb"] + params["b_emb"]
            comb = jnp.concatenate([emb, h], axis=1)
            ig = jax.nn.sigmoid(comb @ w[0] + b[0])
            og = jax.nn.sigmoid(comb @ w[1] + b[1])
            fg = jax.nn.sigmoid(comb @ w[2] + b[2])
            gg = jnp.tanh(comb @ w[3] + b[3])
            c = fg * c + ig * gg
            h = og * jnp.tanh(c)
            hs.append(h)
            cs.append(c)
        return hs, cs

    fh, fc = run(oh, params["w_r"], params["b_r"])
    bh, bc = run(oh[::-1], params["w_l"], params["b_l"])
    hcat = jnp.stack([jnp.concatenate([fh[i], bh[i]], 1) for i in range(len(fh))])
    ccat = jnp.stack([jnp.concatenate([fc[i], bc[i]], 1) for i in range(len(fc))])
    return hcat, ccat


if __name__ == "__main__":
    V, H, L = 16, 32, 8  # input_size (vocab), hidden_size, sequence length

    key = jax.random.PRNGKey(0)
    ks = jax.random.split(key, 7)
    params = {
        "w_emb": jax.random.normal(ks[0], (V, H), jnp.float32) * 0.1,
        "b_emb": jax.random.normal(ks[1], (1, H), jnp.float32) * 0.1,
        "w_r":   jax.random.normal(ks[2], (4, 2 * H, H), jnp.float32) * 0.1,
        "b_r":   jax.random.normal(ks[3], (4, 1, H), jnp.float32) * 0.1,
        "w_l":   jax.random.normal(ks[4], (4, 2 * H, H), jnp.float32) * 0.1,
        "b_l":   jax.random.normal(ks[5], (4, 1, H), jnp.float32) * 0.1,
    }
    tokens = jax.random.randint(ks[6], (L,), 0, V)

    h_out, c_out = encoder_forward(tokens, params, H)
    jax.block_until_ready((h_out, c_out))

    h_ref, c_ref = reference_forward(tokens, params, H)
    assert jnp.allclose(h_out, h_ref, atol=1e-5, rtol=1e-5), "hidden mismatch"
    assert jnp.allclose(c_out, c_ref, atol=1e-5, rtol=1e-5), "cell mismatch"

    print("KERNEL_OK")
</pallas_src>

<mosaic_0001>
module attributes {stable_mosaic.version = 11 : i64} {
  func.func @bi_lstm_kernel(%arg0: i32, %arg1: memref<8x64xf32, #tpu.memory_space<vmem>>, %arg2: memref<64x256xf32, #tpu.memory_space<vmem>>, %arg3: memref<64x256xf32, #tpu.memory_space<vmem>>, %arg4: memref<1x256xf32, #tpu.memory_space<vmem>>, %arg5: memref<8x128xf32, #tpu.memory_space<vmem>>, %arg6: memref<8x256xf32, #tpu.memory_space<vmem>>) attributes {dimension_semantics = [#tpu.dimension_semantics<arbitrary>], iteration_bounds = array<i64: 1>, scalar_prefetch = 0 : i64, scratch_operands = 1 : i64, tpu.core_type = #tpu.core_type<tc>, window_params = [{pipeline_mode = #tpu.pipeline_mode<synchronous>, transform_indices = @transform_0, window_bounds = array<i64: 8, 64>}, {pipeline_mode = #tpu.pipeline_mode<synchronous>, transform_indices = @transform_1, window_bounds = array<i64: 64, 256>}, {pipeline_mode = #tpu.pipeline_mode<synchronous>, transform_indices = @transform_2, window_bounds = array<i64: 64, 256>}, {pipeline_mode = #tpu.pipeline_mode<synchronous>, transform_indices = @transform_3, window_bounds = array<i64: 1, 256>}, {pipeline_mode = #tpu.pipeline_mode<synchronous>, transform_indices = @transform_4, window_bounds = array<i64: 8, 128>}]} {
    %c0 = arith.constant 0 : index
    %c0_0 = arith.constant 0 : index
    %0 = vector.load %arg3[%c0, %c0_0] : memref<64x256xf32, #tpu.memory_space<vmem>>, vector<64x256xf32>
    %c0_1 = arith.constant 0 : index
    %c0_2 = arith.constant 0 : index
    %1 = vector.load %arg1[%c0_1, %c0_2] : memref<8x64xf32, #tpu.memory_space<vmem>>, vector<8x64xf32>
    %c0_3 = arith.constant 0 : index
    %c0_4 = arith.constant 0 : index
    %2 = vector.load %arg2[%c0_3, %c0_4] : memref<64x256xf32, #tpu.memory_space<vmem>>, vector<64x256xf32>
    %cst = arith.constant dense<0.000000e+00> : vector<8x256xf32>
    %3 = tpu.matmul %1, %2, %cst {dimension_numbers = #tpu.dot_dimension_numbers<[1], [0], [0], [1], [0, 0, 1, 1], [], []>} : vector<8x64xf32>, vector<64x256xf32>, vector<8x256xf32> -> vector<8x256xf32>
    %c0_5 = arith.constant 0 : index
    %c0_6 = arith.constant 0 : index
    %4 = vector.load %arg4[%c0_5, %c0_6] : memref<1x256xf32, #tpu.memory_space<vmem>>, vector<1x256xf32>
    %5 = vector.broadcast %4 : vector<1x256xf32> to vector<8x256xf32>
    %6 = arith.addf %3, %5 : vector<8x256xf32>
    %c0_7 = arith.constant 0 : index
    %c0_8 = arith.constant 0 : index
    %7 = vector.load %arg6[%c0_7, %c0_8] : memref<8x256xf32, #tpu.memory_space<vmem>>, vector<8x256xf32>
    tpu.vector_store %arg6[%c0_7, %c0_8], %6 {strides = array<i32>} : memref<8x256xf32, #tpu.memory_space<vmem>>, vector<8x256xf32>,
    %cst_9 = arith.constant 0.000000e+00 : f32
    %8 = vector.broadcast %cst_9 : f32 to vector<1x64xf32>
    %c0_i32 = arith.constant 0 : i32
    %9 = arith.index_cast %c0_i32 : i32 to index
    %c0_10 = arith.constant 0 : index
    %10 = vector.load %arg6[%9, %c0_10] : memref<8x256xf32, #tpu.memory_space<vmem>>, vector<1x256xf32>
    %cst_11 = arith.constant dense<0.000000e+00> : vector<1x256xf32>
    %11 = tpu.matmul %8, %0, %cst_11 {dimension_numbers = #tpu.dot_dimension_numbers<[1], [0], [0], [1], [0, 0, 1, 1], [], []>} : vector<1x64xf32>, vector<64x256xf32>, vector<1x256xf32> -> vector<1x256xf32>
    %12 = arith.addf %10, %11 : vector<1x256xf32>
    %13 = arith.negf %12 : vector<1x256xf32>
    %14 = math.exp %13 : vector<1x256xf32>
    %cst_12 = arith.constant 1.000000e+00 : f32
    %15 = vector.broadcast %cst_12 : f32 to vector<1x256xf32>
    %16 = arith.addf %15, %14 : vector<1x256xf32>
    %17 = arith.divf %15, %16 : vector<1x256xf32>
    %18 = vector.extract_strided_slice %17 {offsets = [0, 0], sizes = [1, 64], strides = [1, 1]} : vector<1x256xf32> to vector<1x64xf32>
    %19 = vector.extract_strided_slice %17 {offsets = [0, 64], sizes = [1, 64], strides = [1, 1]} : vector<1x256xf32> to vector<1x64xf32>
    %20 = vector.extract_strided_slice %17 {offsets = [0, 128], sizes = [1, 64], strides = [1, 1]} : vector<1x256xf32> to vector<1x64xf32>
    %21 = vector.extract_strided_slice %12 {offsets = [0, 192], sizes = [1, 64], strides = [1, 1]} : vector<1x256xf32> to vector<1x64xf32>
    %22 = math.tanh %21 : vector<1x64xf32>
    %23 = arith.mulf %20, %8 : vector<1x64xf32>
    %24 = arith.mulf %18, %22 : vector<1x64xf32>
    %25 = arith.addf %23, %24 : vector<1x64xf32>
    %26 = math.tanh %25 : vector<1x64xf32>
    %27 = arith.mulf %19, %26 : vector<1x64xf32>
    %28 = tpu.concatenate %27, %25 in 1 : vector<1x64xf32>, vector<1x64xf32> -> vector<1x128xf32>
    %29 = arith.index_cast %c0_i32 : i32 to index
    %c0_13 = arith.constant 0 : index
    %30 = vector.load %arg5[%29, %c0_13] : memref<8x128xf32, #tpu.memory_space<vmem>>, vector<1x128xf32>
    tpu.vector_store %arg5[%29, %c0_13], %28 {strides = array<i32>} : memref<8x128xf32, #tpu.memory_space<vmem>>, vector<1x128xf32>,
    %c1_i32 = arith.constant 1 : i32
    %31 = arith.index_cast %c1_i32 : i32 to index
    %c0_14 = arith.constant 0 : index
    %32 = vector.load %arg6[%31, %c0_14] : memref<8x256xf32, #tpu.memory_space<vmem>>, vector<1x256xf32>
    %cst_15 = arith.constant dense<0.000000e+00> : vector<1x256xf32>
    %33 = tpu.matmul %27, %0, %cst_15 {dimension_numbers = #tpu.dot_dimension_numbers<[1], [0], [0], [1], [0, 0, 1, 1], [], []>} : vector<1x64xf32>, vector<64x256xf32>, vector<1x256xf32> -> vector<1x256xf32>
    %34 = arith.addf %32, %33 : vector<1x256xf32>
    %35 = arith.negf %34 : vector<1x256xf32>
    %36 = math.exp %35 : vector<1x256xf32>
    %cst_16 = arith.constant 1.000000e+00 : f32
    %37 = vector.broadcast %cst_16 : f32 to vector<1x256xf32>
    %38 = arith.addf %37, %36 : vector<1x256xf32>
    %39 = arith.divf %37, %38 : vector<1x256xf32>
    %40 = vector.extract_strided_slice %39 {offsets = [0, 0], sizes = [1, 64], strides = [1, 1]} : vector<1x256xf32> to vector<1x64xf32>
    %41 = vector.extract_strided_slice %39 {offsets = [0, 64], sizes = [1, 64], strides = [1, 1]} : vector<1x256xf32> to vector<1x64xf32>
    %42 = vector.extract_strided_slice %39 {offsets = [0, 128], sizes = [1, 64], strides = [1, 1]} : vector<1x256xf32> to vector<1x64xf32>
    %43 = vector.extract_strided_slice %34 {offsets = [0, 192], sizes = [1, 64], strides = [1, 1]} : vector<1x256xf32> to vector<1x64xf32>
    %44 = math.tanh %43 : vector<1x64xf32>
    %45 = arith.mulf %42, %25 : vector<1x64xf32>
    %46 = arith.mulf %40, %44 : vector<1x64xf32>
    %47 = arith.addf %45, %46 : vector<1x64xf32>
    %48 = math.tanh %47 : vector<1x64xf32>
    %49 = arith.mulf %41, %48 : vector<1x64xf32>
    %50 = tpu.concatenate %49, %47 in 1 : vector<1x64xf32>, vector<1x64xf32> -> vector<1x128xf32>
    %51 = arith.index_cast %c1_i32 : i32 to index
    %c0_17 = arith.constant 0 : index
    %52 = vector.load %arg5[%51, %c0_17] : memref<8x128xf32, #tpu.memory_space<vmem>>, vector<1x128xf32>
    tpu.vector_store %arg5[%51, %c0_17], %50 {strides = array<i32>} : memref<8x128xf32, #tpu.memory_space<vmem>>, vector<1x128xf32>,
    %c2_i32 = arith.constant 2 : i32
    %53 = arith.index_cast %c2_i32 : i32 to index
    %c0_18 = arith.constant 0 : index
    %54 = vector.load %arg6[%53, %c0_18] : memref<8x256xf32, #tpu.memory_space<vmem>>, vector<1x256xf32>
    %cst_19 = arith.constant dense<0.000000e+00> : vector<1x256xf32>
    %55 = tpu.matmul %49, %0, %cst_19 {dimension_numbers = #tpu.dot_dimension_numbers<[1], [0], [0], [1], [0, 0, 1, 1], [], []>} : vector<1x64xf32>, vector<64x256xf32>, vector<1x256xf32> -> vector<1x256xf32>
    %56 = arith.addf %54, %55 : vector<1x256xf32>
    %57 = arith.negf %56 : vector<1x256xf32>
    %58 = math.exp %57 : vector<1x256xf32>
    %cst_20 = arith.constant 1.000000e+00 : f32
    %59 = vector.broadcast %cst_20 : f32 to vector<1x256xf32>
    %60 = arith.addf %59, %58 : vector<1x256xf32>
    %61 = arith.divf %59, %60 : vector<1x256xf32>
    %62 = vector.extract_strided_slice %61 {offsets = [0, 0], sizes = [1, 64], strides = [1, 1]} : vector<1x256xf32> to vector<1x64xf32>
    %63 = vector.extract_strided_slice %61 {offsets = [0, 64], sizes = [1, 64], strides = [1, 1]} : vector<1x256xf32> to vector<1x64xf32>
    %64 = vector.extract_strided_slice %61 {offsets = [0, 128], sizes = [1, 64], strides = [1, 1]} : vector<1x256xf32> to vector<1x64xf32>
    %65 = vector.extract_strided_slice %56 {offsets = [0, 192], sizes = [1, 64], strides = [1, 1]} : vector<1x256xf32> to vector<1x64xf32>
    %66 = math.tanh %65 : vector<1x64xf32>
    %67 = arith.mulf %64, %47 : vector<1x64xf32>
    %68 = arith.mulf %62, %66 : vector<1x64xf32>
    %69 = arith.addf %67, %68 : vector<1x64xf32>
    %70 = math.tanh %69 : vector<1x64xf32>
    %71 = arith.mulf %63, %70 : vector<1x64xf32>
    %72 = tpu.concatenate %71, %69 in 1 : vector<1x64xf32>, vector<1x64xf32> -> vector<1x128xf32>
    %73 = arith.index_cast %c2_i32 : i32 to index
    %c0_21 = arith.constant 0 : index
    %74 = vector.load %arg5[%73, %c0_21] : memref<8x128xf32, #tpu.memory_space<vmem>>, vector<1x128xf32>
    tpu.vector_store %arg5[%73, %c0_21], %72 {strides = array<i32>} : memref<8x128xf32, #tpu.memory_space<vmem>>, vector<1x128xf32>,
    %c3_i32 = arith.constant 3 : i32
    %75 = arith.index_cast %c3_i32 : i32 to index
    %c0_22 = arith.constant 0 : index
    %76 = vector.load %arg6[%75, %c0_22] : memref<8x256xf32, #tpu.memory_space<vmem>>, vector<1x256xf32>
    %cst_23 = arith.constant dense<0.000000e+00> : vector<1x256xf32>
    %77 = tpu.matmul %71, %0, %cst_23 {dimension_numbers = #tpu.dot_dimension_numbers<[1], [0], [0], [1], [0, 0, 1, 1], [], []>} : vector<1x64xf32>, vector<64x256xf32>, vector<1x256xf32> -> vector<1x256xf32>
    %78 = arith.addf %76, %77 : vector<1x256xf32>
    %79 = arith.negf %78 : vector<1x256xf32>
    %80 = math.exp %79 : vector<1x256xf32>
    %cst_24 = arith.constant 1.000000e+00 : f32
    %81 = vector.broadcast %cst_24 : f32 to vector<1x256xf32>
    %82 = arith.addf %81, %80 : vector<1x256xf32>
    %83 = arith.divf %81, %82 : vector<1x256xf32>
    %84 = vector.extract_strided_slice %83 {offsets = [0, 0], sizes = [1, 64], strides = [1, 1]} : vector<1x256xf32> to vector<1x64xf32>
    %85 = vector.extract_strided_slice %83 {offsets = [0, 64], sizes = [1, 64], strides = [1, 1]} : vector<1x256xf32> to vector<1x64xf32>
    %86 = vector.extract_strided_slice %83 {offsets = [0, 128], sizes = [1, 64], strides = [1, 1]} : vector<1x256xf32> to vector<1x64xf32>
    %87 = vector.extract_strided_slice %78 {offsets = [0, 192], sizes = [1, 64], strides = [1, 1]} : vector<1x256xf32> to vector<1x64xf32>
    %88 = math.tanh %87 : vector<1x64xf32>
    %89 = arith.mulf %86, %69 : vector<1x64xf32>
    %90 = arith.mulf %84, %88 : vector<1x64xf32>
    %91 = arith.addf %89, %90 : vector<1x64xf32>
    %92 = math.tanh %91 : vector<1x64xf32>
    %93 = arith.mulf %85, %92 : vector<1x64xf32>
    %94 = tpu.concatenate %93, %91 in 1 : vector<1x64xf32>, vector<1x64xf32> -> vector<1x128xf32>
    %95 = arith.index_cast %c3_i32 : i32 to index
    %c0_25 = arith.constant 0 : index
    %96 = vector.load %arg5[%95, %c0_25] : memref<8x128xf32, #tpu.memory_space<vmem>>, vector<1x128xf32>
    tpu.vector_store %arg5[%95, %c0_25], %94 {strides = array<i32>} : memref<8x128xf32, #tpu.memory_space<vmem>>, vector<1x128xf32>,
    %c4_i32 = arith.constant 4 : i32
    %97 = arith.index_cast %c4_i32 : i32 to index
    %c0_26 = arith.constant 0 : index
    %98 = vector.load %arg6[%97, %c0_26] : memref<8x256xf32, #tpu.memory_space<vmem>>, vector<1x256xf32>
    %cst_27 = arith.constant dense<0.000000e+00> : vector<1x256xf32>
    %99 = tpu.matmul %93, %0, %cst_27 {dimension_numbers = #tpu.dot_dimension_numbers<[1], [0], [0], [1], [0, 0, 1, 1], [], []>} : vector<1x64xf32>, vector<64x256xf32>, vector<1x256xf32> -> vector<1x256xf32>
    %100 = arith.addf %98, %99 : vector<1x256xf32>
    %101 = arith.negf %100 : vector<1x256xf32>
    %102 = math.exp %101 : vector<1x256xf32>
    %cst_28 = arith.constant 1.000000e+00 : f32
    %103 = vector.broadcast %cst_28 : f32 to vector<1x256xf32>
    %104 = arith.addf %103, %102 : vector<1x256xf32>
    %105 = arith.divf %103, %104 : vector<1x256xf32>
    %106 = vector.extract_strided_slice %105 {offsets = [0, 0], sizes = [1, 64], strides = [1, 1]} : vector<1x256xf32> to vector<1x64xf32>
    %107 = vector.extract_strided_slice %105 {offsets = [0, 64], sizes = [1, 64], strides = [1, 1]} : vector<1x256xf32> to vector<1x64xf32>
    %108 = vector.extract_strided_slice %105 {offsets = [0, 128], sizes = [1, 64], strides = [1, 1]} : vector<1x256xf32> to vector<1x64xf32>
    %109 = vector.extract_strided_slice %100 {offsets = [0, 192], sizes = [1, 64], strides = [1, 1]} : vector<1x256xf32> to vector<1x64xf32>
    %110 = math.tanh %109 : vector<1x64xf32>
    %111 = arith.mulf %108, %91 : vector<1x64xf32>
    %112 = arith.mulf %106, %110 : vector<1x64xf32>
    %113 = arith.addf %111, %112 : vector<1x64xf32>
    %114 = math.tanh %113 : vector<1x64xf32>
    %115 = arith.mulf %107, %114 : vector<1x64xf32>
    %116 = tpu.concatenate %115, %113 in 1 : vector<1x64xf32>, vector<1x64xf32> -> vector<1x128xf32>
    %117 = arith.index_cast %c4_i32 : i32 to index
    %c0_29 = arith.constant 0 : index
    %118 = vector.load %arg5[%117, %c0_29] : memref<8x128xf32, #tpu.memory_space<vmem>>, vector<1x128xf32>
    tpu.vector_store %arg5[%117, %c0_29], %116 {strides = array<i32>} : memref<8x128xf32, #tpu.memory_space<vmem>>, vector<1x128xf32>,
    %c5_i32 = arith.constant 5 : i32
    %119 = arith.index_cast %c5_i32 : i32 to index
    %c0_30 = arith.constant 0 : index
    %120 = vector.load %arg6[%119, %c0_30] : memref<8x256xf32, #tpu.memory_space<vmem>>, vector<1x256xf32>
    %cst_31 = arith.constant dense<0.000000e+00> : vector<1x256xf32>
    %121 = tpu.matmul %115, %0, %cst_31 {dimension_numbers = #tpu.dot_dimension_numbers<[1], [0], [0], [1], [0, 0, 1, 1], [], []>} : vector<1x64xf32>, vector<64x256xf32>, vector<1x256xf32> -> vector<1x256xf32>
    %122 = arith.addf %120, %121 : vector<1x256xf32>
    %123 = arith.negf %122 : vector<1x256xf32>
    %124 = math.exp %123 : vector<1x256xf32>
    %cst_32 = arith.constant 1.000000e+00 : f32
    %125 = vector.broadcast %cst_32 : f32 to vector<1x256xf32>
    %126 = arith.addf %125, %124 : vector<1x256xf32>
    %127 = arith.divf %125, %126 : vector<1x256xf32>
    %128 = vector.extract_strided_slice %127 {offsets = [0, 0], sizes = [1, 64], strides = [1, 1]} : vector<1x256xf32> to vector<1x64xf32>
    %129 = vector.extract_strided_slice %127 {offsets = [0, 64], sizes = [1, 64], strides = [1, 1]} : vector<1x256xf32> to vector<1x64xf32>
    %130 = vector.extract_strided_slice %127 {offsets = [0, 128], sizes = [1, 64], strides = [1, 1]} : vector<1x256xf32> to vector<1x64xf32>
    %131 = vector.extract_strided_slice %122 {offsets = [0, 192], sizes = [1, 64], strides = [1, 1]} : vector<1x256xf32> to vector<1x64xf32>
    %132 = math.tanh %131 : vector<1x64xf32>
    %133 = arith.mulf %130, %113 : vector<1x64xf32>
    %134 = arith.mulf %128, %132 : vector<1x64xf32>
    %135 = arith.addf %133, %134 : vector<1x64xf32>
    %136 = math.tanh %135 : vector<1x64xf32>
    %137 = arith.mulf %129, %136 : vector<1x64xf32>
    %138 = tpu.concatenate %137, %135 in 1 : vector<1x64xf32>, vector<1x64xf32> -> vector<1x128xf32>
    %139 = arith.index_cast %c5_i32 : i32 to index
    %c0_33 = arith.constant 0 : index
    %140 = vector.load %arg5[%139, %c0_33] : memref<8x128xf32, #tpu.memory_space<vmem>>, vector<1x128xf32>
    tpu.vector_store %arg5[%139, %c0_33], %138 {strides = array<i32>} : memref<8x128xf32, #tpu.memory_space<vmem>>, vector<1x128xf32>,
    %c6_i32 = arith.constant 6 : i32
    %141 = arith.index_cast %c6_i32 : i32 to index
    %c0_34 = arith.constant 0 : index
    %142 = vector.load %arg6[%141, %c0_34] : memref<8x256xf32, #tpu.memory_space<vmem>>, vector<1x256xf32>
    %cst_35 = arith.constant dense<0.000000e+00> : vector<1x256xf32>
    %143 = tpu.matmul %137, %0, %cst_35 {dimension_numbers = #tpu.dot_dimension_numbers<[1], [0], [0], [1], [0, 0, 1, 1], [], []>} : vector<1x64xf32>, vector<64x256xf32>, vector<1x256xf32> -> vector<1x256xf32>
    %144 = arith.addf %142, %143 : vector<1x256xf32>
    %145 = arith.negf %144 : vector<1x256xf32>
    %146 = math.exp %145 : vector<1x256xf32>
    %cst_36 = arith.constant 1.000000e+00 : f32
    %147 = vector.broadcast %cst_36 : f32 to vector<1x256xf32>
    %148 = arith.addf %147, %146 : vector<1x256xf32>
    %149 = arith.divf %147, %148 : vector<1x256xf32>
    %150 = vector.extract_strided_slice %149 {offsets = [0, 0], sizes = [1, 64], strides = [1, 1]} : vector<1x256xf32> to vector<1x64xf32>
    %151 = vector.extract_strided_slice %149 {offsets = [0, 64], sizes = [1, 64], strides = [1, 1]} : vector<1x256xf32> to vector<1x64xf32>
    %152 = vector.extract_strided_slice %149 {offsets = [0, 128], sizes = [1, 64], strides = [1, 1]} : vector<1x256xf32> to vector<1x64xf32>
    %153 = vector.extract_strided_slice %144 {offsets = [0, 192], sizes = [1, 64], strides = [1, 1]} : vector<1x256xf32> to vector<1x64xf32>
    %154 = math.tanh %153 : vector<1x64xf32>
    %155 = arith.mulf %152, %135 : vector<1x64xf32>
    %156 = arith.mulf %150, %154 : vector<1x64xf32>
    %157 = arith.addf %155, %156 : vector<1x64xf32>
    %158 = math.tanh %157 : vector<1x64xf32>
    %159 = arith.mulf %151, %158 : vector<1x64xf32>
    %160 = tpu.concatenate %159, %157 in 1 : vector<1x64xf32>, vector<1x64xf32> -> vector<1x128xf32>
    %161 = arith.index_cast %c6_i32 : i32 to index
    %c0_37 = arith.constant 0 : index
    %162 = vector.load %arg5[%161, %c0_37] : memref<8x128xf32, #tpu.memory_space<vmem>>, vector<1x128xf32>
    tpu.vector_store %arg5[%161, %c0_37], %160 {strides = array<i32>} : memref<8x128xf32, #tpu.memory_space<vmem>>, vector<1x128xf32>,
    %c7_i32 = arith.constant 7 : i32
    %163 = arith.index_cast %c7_i32 : i32 to index
    %c0_38 = arith.constant 0 : index
    %164 = vector.load %arg6[%163, %c0_38] : memref<8x256xf32, #tpu.memory_space<vmem>>, vector<1x256xf32>
    %cst_39 = arith.constant dense<0.000000e+00> : vector<1x256xf32>
    %165 = tpu.matmul %159, %0, %cst_39 {dimension_numbers = #tpu.dot_dimension_numbers<[1], [0], [0], [1], [0, 0, 1, 1], [], []>} : vector<1x64xf32>, vector<64x256xf32>, vector<1x256xf32> -> vector<1x256xf32>
    %166 = arith.addf %164, %165 : vector<1x256xf32>
    %167 = arith.negf %166 : vector<1x256xf32>
    %168 = math.exp %167 : vector<1x256xf32>
    %cst_40 = arith.constant 1.000000e+00 : f32
    %169 = vector.broadcast %cst_40 : f32 to vector<1x256xf32>
    %170 = arith.addf %169, %168 : vector<1x256xf32>
    %171 = arith.divf %169, %170 : vector<1x256xf32>
    %172 = vector.extract_strided_slice %171 {offsets = [0, 0], sizes = [1, 64], strides = [1, 1]} : vector<1x256xf32> to vector<1x64xf32>
    %173 = vector.extract_strided_slice %171 {offsets = [0, 64], sizes = [1, 64], strides = [1, 1]} : vector<1x256xf32> to vector<1x64xf32>
    %174 = vector.extract_strided_slice %171 {offsets = [0, 128], sizes = [1, 64], strides = [1, 1]} : vector<1x256xf32> to vector<1x64xf32>
    %175 = vector.extract_strided_slice %166 {offsets = [0, 192], sizes = [1, 64], strides = [1, 1]} : vector<1x256xf32> to vector<1x64xf32>
    %176 = math.tanh %175 : vector<1x64xf32>
    %177 = arith.mulf %174, %157 : vector<1x64xf32>
    %178 = arith.mulf %172, %176 : vector<1x64xf32>
    %179 = arith.addf %177, %178 : vector<1x64xf32>
    %180 = math.tanh %179 : vector<1x64xf32>
    %181 = arith.mulf %173, %180 : vector<1x64xf32>
    %182 = tpu.concatenate %181, %179 in 1 : vector<1x64xf32>, vector<1x64xf32> -> vector<1x128xf32>
    %183 = arith.index_cast %c7_i32 : i32 to index
    %c0_41 = arith.constant 0 : index
    %184 = vector.load %arg5[%183, %c0_41] : memref<8x128xf32, #tpu.memory_space<vmem>>, vector<1x128xf32>
    tpu.vector_store %arg5[%183, %c0_41], %182 {strides = array<i32>} : memref<8x128xf32, #tpu.memory_space<vmem>>, vector<1x128xf32>,
    %c8_i32 = arith.constant 8 : i32
    return
  }
  func.func @transform_0(%arg0: i32) -> (i32, i32) {
    %c0_i32 = arith.constant 0 : i32
    %c0_i32_0 = arith.constant 0 : i32
    %c0_i32_1 = arith.constant 0 : i32
    return %c0_i32, %c0_i32_0 : i32, i32
  }
  func.func @transform_1(%arg0: i32) -> (i32, i32) {
    %c0_i32 = arith.constant 0 : i32
    %c0_i32_0 = arith.constant 0 : i32
    %c0_i32_1 = arith.constant 0 : i32
    return %c0_i32, %c0_i32_0 : i32, i32
  }
  func.func @transform_2(%arg0: i32) -> (i32, i32) {
    %c0_i32 = arith.constant 0 : i32
    %c0_i32_0 = arith.constant 0 : i32
    %c0_i32_1 = arith.constant 0 : i32
    return %c0_i32, %c0_i32_0 : i32, i32
  }
  func.func @transform_3(%arg0: i32) -> (i32, i32) {
    %c0_i32 = arith.constant 0 : i32
    %c0_i32_0 = arith.constant 0 : i32
    %c0_i32_1 = arith.constant 0 : i32
    return %c0_i32, %c0_i32_0 : i32, i32
  }
  func.func @transform_4(%arg0: i32) -> (i32, i32) {
    %c0_i32 = arith.constant 0 : i32
    %c0_i32_0 = arith.constant 0 : i32
    %c0_i32_1 = arith.constant 0 : i32
    return %c0_i32, %c0_i32_0 : i32, i32
  }
}

</mosaic_0001>

<bundles_post_ra>
// kernel: tpu_custom_call.1
= control target key start
LH: loop header
LB: loop body
LE: loop exit
PB: predicated region body
PF: predicated region fallthrough
CT: control target
= control target key end

     0   :  { %9 = vsyncpa [#allocation4], 0  ;;  %s1930_s0 = inlined_call_operand.hbm [shape: f32[8,64], index: 0, kind: input, shape index: {}]   ;;  %s1931_s1 = inlined_call_operand.hbm [shape: f32[64,256], index: 1, kind: input, shape index: {}]   ;;  %s1932_s2 = inlined_call_operand.hbm [shape: f32[64,256], index: 2, kind: input, shape index: {}]   ;;  %s1933_s3 = inlined_call_operand.vmem [shape: f32[1,256], index: 3, kind: input, shape index: {}]   ;;  %s1934_s4 = inlined_call_operand.hbm [shape: f32[8,128], index: 4, kind: output, shape index: {}]  }
   0x1   :  { %10 = vsyncpa [#allocation7], 0 }
   0x2   :  { %11 = vsyncpa [#allocation5], 0  ;;  %s1610_s15 = smov [#allocation6]   ;;  %s1516_s19 = scalar_lea.hbm %s1931_s1, 2048 }
   0x3   :  { %s27_s16 = sshll.u32 %s1610_s15, 4  ;;  %p1517_p0 = scmp.ne.s32.totalorder %s1931_s1, %s1516_s19  ;;  %s28_s16 = int_to_ptr.vmem [resolvable:$true] %s27_s16 }
   0x4   :  { %p1520_p1 = scmp.lt.u32.totalorder %s1516_s19, %s1931_s1 }
   0x6   :  { %p1522_p2 = pnand %p1520_p1, %p1517_p0 }
   0x8   :  { %1525 = shalt.err (!%p1522_p2)
}
   0x9   :  { %s1526_s24 = scalar_lea.vmem %s28_s16, 2048  ;;  %p1531_p4 = scmp.lt.s32.totalorder %s28_s16, %s28_s16 }
   0xa   :  { %p1527_p3 = scmp.ne.s32.totalorder %s28_s16, %s1526_s24  ;;  %p1532_p5 = scmp.lt.s32.totalorder %s1526_s24, %s1526_s24 }
   0xc   :  { %p1533_p6 = por %p1532_p5, %p1531_p4 }
   0xe   :  { %p1534_p7 = pnand %p1533_p6, %p1527_p3 }
  0x10   :  { %1537 = shalt.err (!%p1534_p7)
}
  0x11   :  { %s1611_s25 = smov 256   ;;  %s1612_s26 = smov 16  }
  0x12   :  { %33 = dma.hbm_to_vmem [thread:$0]  %s1931_s1, 2048, %s28_s16, [#allocation7], %s1611_s25, %s1611_s25, %s1612_s26  }
  0x13   :  { %s1613_s29 = smov [#allocation3]   ;;  %s1614_s5 = smov [#allocation8]  }
  0x14   :  { %s18_s30 = sshll.u32 %s1613_s29, 4  ;;  %s39_s6 = sshll.u32 %s1614_s5, 4  ;;  %s19_s30 = int_to_ptr.vmem [resolvable:$true] %s18_s30  ;;  %s40_s6 = int_to_ptr.vmem [resolvable:$true] %s39_s6 }
  0x15   :  { %s1538_s9 = scalar_lea.hbm %s1930_s0, 128 }
  0x16   :  { %p1539_p8 = scmp.ne.s32.totalorder %s1930_s0, %s1538_s9  ;;  %p1542_p9 = scmp.lt.u32.totalorder %s1538_s9, %s1930_s0 }
  0x18   :  { %p1544_p10 = pnand %p1542_p9, %p1539_p8 }
  0x1a   :  { %1547 = shalt.err (!%p1544_p10)
}
  0x1b   :  { %s1548_s1 = scalar_lea.vmem %s19_s30, 128  ;;  %p1553_p12 = scmp.lt.s32.totalorder %s19_s30, %s19_s30 }
  0x1c   :  { %p1549_p11 = scmp.ne.s32.totalorder %s19_s30, %s1548_s1  ;;  %p1554_p13 = scmp.lt.s32.totalorder %s1548_s1, %s1548_s1 }
  0x1e   :  { %p1555_p0 = por %p1554_p13, %p1553_p12 }
  0x20   :  { %p1556_p1 = pnand %p1555_p0, %p1549_p11 }
  0x22   :  { %1559 = shalt.err (!%p1556_p1)
}
  0x23   :  { %21 = dma.hbm_to_vmem [thread:$0]  %s1930_s0, 128, %s19_s30, [#allocation4]  }
  0x24   :  { %s1560_s18 = scalar_lea.hbm %s1932_s2, 2048 }
  0x25   :  { %p1561_p2 = scmp.ne.s32.totalorder %s1932_s2, %s1560_s18  ;;  %p1564_p3 = scmp.lt.u32.totalorder %s1560_s18, %s1932_s2 }
  0x27   :  { %p1566_p4 = pnand %p1564_p3, %p1561_p2 }
  0x29   :  { %1569 = shalt.err (!%p1566_p4)
}
  0x2a   :  { %s1570_s23 = scalar_lea.vmem %s40_s6, 2048  ;;  %p1575_p6 = scmp.lt.s32.totalorder %s40_s6, %s40_s6 }
  0x2b   :  { %p1571_p5 = scmp.ne.s32.totalorder %s40_s6, %s1570_s23  ;;  %p1576_p7 = scmp.lt.s32.totalorder %s1570_s23, %s1570_s23 }
  0x2d   :  { %p1577_p8 = por %p1576_p7, %p1575_p6 }
  0x2f   :  { %p1578_p9 = pnand %p1577_p8, %p1571_p5 }
  0x31   :  { %1581 = shalt.err (!%p1578_p9)
}
  0x32   :  { %45 = dma.hbm_to_vmem [thread:$0]  %s1932_s2, 2048, %s40_s6, [#allocation7], %s1611_s25, %s1611_s25, %s1612_s26  }
  0x33   :  { %1604 = dma.done.wait [#allocation4], 128  }
  0x34   :  { %1605 = vsyncadd [#allocation4], 4294967168 }
  0x35   :  { %1606 = dma.done.wait [#allocation7], 4096  }
  0x36   :  { %1607 = vsyncadd [#allocation7], 4294963200  ;;  %v1615_v0 = vmov 0.0   ;;  %v75_v1 = vld [vmem:[#allocation6 + $0x8] sm:$0xff]  ;;  %v77_v2 = vld [vmem:[#allocation6 + $0x18] sm:$0xff]  ;;  %vm102_vm0 = vcmask 523264   ;;  %v92_v50 = vlaneseq }
  0x37   :  { %170 = vmatprep.mubr.f32.mxu0 %v1615_v0  ;;  %247 = vmatprep.mubr.f32.mxu1 %v1615_v0  ;;  %v74_v3 = vld [vmem:[#allocation6] sm:$0xff]  ;;  %v1299_v4 = vpack.c.bf16 %v77_v2, %v75_v1  ;;  %v76_v5 = vld [vmem:[#allocation6 + $0x10] sm:$0xff]  ;;  %v58_v6 = vld [vmem:[#allocation8 + $0x8] sm:$0xff]  ;;  %v1616_v55 = vmov 1966171168   ;;  %s1618_s26 = smov [#allocation9]  }
  0x38   :  { %v60_v7 = vld [vmem:[#allocation8 + $0x18] sm:$0xff]  ;;  %v1301_v8 = vpack.c.bf16 %v76_v5, %v74_v3  ;;  %v79_v10 = vld [vmem:[#allocation6 + $0x28] sm:$0xff]  ;;  %v57_v12 = vld [vmem:[#allocation8] sm:$0xff]  ;;  %v93_v51 = vshrl.u32 %v92_v50, 7  ;;  %v258_v56 = vunpack.c.l.s4 %v1616_v55  ;;  %s1273_s27 = sshll.u32 %s1618_s26, 4  ;;  %s1274_s27 = int_to_ptr.vmem [resolvable:$true] %s1273_s27 }
  0x39   :  { %v1688_v9 = vpack.c.bf16 %v60_v7, %v58_v6  ;;  %v81_v11 = vld [vmem:[#allocation6 + $0x38] sm:$0xff]  ;;  %1300 = vmatprep.subr.bf16.mxu0 %v1299_v4  ;;  %v59_v14 = vld [vmem:[#allocation8 + $0x10] sm:$0xff]  ;;  %v78_v15 = vld [vmem:[#allocation6 + $0x20] sm:$0xff]  ;;  %s1582_s28 = scalar_lea.vmem %s1274_s27, 128  ;;  %p1587_p11 = scmp.lt.s32.totalorder %s1274_s27, %s1274_s27 }
  0x3a   :  { %v1303_v13 = vpack.c.bf16 %v81_v11, %v79_v10  ;;  %v80_v16 = vld [vmem:[#allocation6 + $0x30] sm:$0xff]  ;;  %1302 = vmatpush1.bf16.msra.mxu0 %v1301_v8  ;;  %v1691_v17 = vpack.c.bf16 %v59_v14, %v57_v12  ;;  %v62_v19 = vld [vmem:[#allocation8 + $0x28] sm:$0xff]  ;;  %v64_v20 = vld [vmem:[#allocation8 + $0x38] sm:$0xff]  ;;  %v1734_v52 = vsub.s32 0, %v93_v51  ;;  %v98_v54 = vsub.s32 1, %v93_v51  ;;  %p1583_p10 = scmp.ne.s32.totalorder %s1274_s27, %s1582_s28  ;;  %p1588_p12 = scmp.lt.s32.totalorder %s1582_s28, %s1582_s28 }
  0x3b   :  { %1316 = vmatprep.subr.bf16.mxu1 %v1688_v9  ;;  %v1305_v18 = vpack.c.bf16 %v80_v16, %v78_v15  ;;  %v83_v21 = vld [vmem:[#allocation6 + $0x48] sm:$0xff]  ;;  %v1693_v22 = vpack.c.bf16 %v64_v20, %v62_v19  ;;  %v85_v23 = vld [vmem:[#allocation6 + $0x58] sm:$0xff]  ;;  %v61_v24 = vld [vmem:[#allocation8 + $0x20] sm:$0xff]  ;;  %v259_v59 = vunpack.c.0.s8 %v258_v56 }
  0x3c   :  { %1304 = vmatprep.subr.bf16.mxu0 %v1303_v13  ;;  %v63_v25 = vld [vmem:[#allocation8 + $0x30] sm:$0xff]  ;;  %1318 = vmatpush1.bf16.msra.mxu1 %v1691_v17  ;;  %v1307_v26 = vpack.c.bf16 %v85_v23, %v83_v21  ;;  %v82_v28 = vld [vmem:[#allocation6 + $0x40] sm:$0xff]  ;;  %v66_v30 = vld [vmem:[#allocation8 + $0x48] sm:$0xff]  ;;  %p1589_p13 = por %p1588_p12, %p1587_p11 }
  0x3d   :  { %v1696_v27 = vpack.c.bf16 %v63_v25, %v61_v24  ;;  %v84_v29 = vld [vmem:[#allocation6 + $0x50] sm:$0xff]  ;;  %1320 = vmatprep.subr.bf16.mxu1 %v1693_v22  ;;  %v68_v31 = vld [vmem:[#allocation8 + $0x58] sm:$0xff]  ;;  %v87_v32 = vld [vmem:[#allocation6 + $0x68] sm:$0xff]  ;;  %v1740_v2 = vsub.s32 %v259_v59, %v93_v51 }
  0x3e   :  { %v89_v33 = vld [vmem:[#allocation6 + $0x78] sm:$0xff]  ;;  %1306 = vmatpush1.bf16.msra.mxu0 %v1305_v18  ;;  %v1309_v34 = vpack.c.bf16 %v84_v29, %v82_v28  ;;  %v1699_v35 = vpack.c.bf16 %v68_v31, %v66_v30  ;;  %v65_v36 = vld [vmem:[#allocation8 + $0x40] sm:$0xff]  ;;  %v67_v37 = vld [vmem:[#allocation8 + $0x50] sm:$0xff]  ;;  %p1590_p0 = pnand %p1589_p13, %p1583_p10 }
  0x3f   :  { %v86_v38 = vld [vmem:[#allocation6 + $0x60] sm:$0xff]  ;;  %1308 = vmatprep.subr.bf16.mxu0 %v1307_v26  ;;  %v1311_v39 = vpack.c.bf16 %v89_v33, %v87_v32  ;;  %v88_v40 = vld [vmem:[#allocation6 + $0x70] sm:$0xff]  ;;  %v70_v41 = vld [vmem:[#allocation8 + $0x68] sm:$0xff]  ;;  %v1702_v43 = vpack.c.bf16 %v67_v37, %v65_v36 }
  0x40   :  { %v72_v42 = vld [vmem:[#allocation8 + $0x78] sm:$0xff]  ;;  %1322 = vmatpush1.bf16.msra.mxu1 %v1696_v27  ;;  %v69_v45 = vld [vmem:[#allocation8 + $0x60] sm:$0xff]  ;;  %v71_v46 = vld [vmem:[#allocation8 + $0x70] sm:$0xff]  ;;  %v1313_v47 = vpack.c.bf16 %v88_v40, %v86_v38 }
  0x41   :  { %1324 = vmatprep.subr.bf16.mxu1 %v1699_v35  ;;  %v1705_v44 = vpack.c.bf16 %v72_v42, %v70_v41  ;;  %v1708_v48 = vpack.c.bf16 %v71_v46, %v69_v45  ;;  %v73_v49 = vld [vmem:[#allocation3] sm:$0xff]  ;;  %v90_v53 = vld [vmem:[%s1933_s3] sm:$0x3]  ;;  %s1617_s3 = smov 64  }
  0x42   :  { %1310 = vmatpush1.bf16.msra.mxu0 %v1309_v34  ;;  %v95_v57 = vrot.slane %v90_v53, %v1734_v52  ;;  %v99_v58 = vrot.slane %v90_v53, %v98_v54 }
  0x43   :  { %1312 = vmatprep.subr.bf16.mxu0 %v1311_v39 }
  0x44   :  { %1326 = vmatpush1.bf16.msra.mxu1 %v1702_v43 }
  0x45   :  { %1328 = vmatprep.subr.bf16.mxu1 %v1705_v44 }
  0x46   :  { %1314 = vmatpush1.bf16.msra.mxu0 %v1313_v47 }
  0x47   :  { %1332 = vmatprep.subr.bf16.mxu0 %v1688_v9 }
  0x48   :  { %1330 = vmatpush1.bf16.msra.mxu1 %v1708_v48 }
  0x49   :  { %1283 = vmatmul.mubr.msk.f32.vlgmr.msra.gmra.mrb[0].mxu0 %vm102_vm0, %v73_v49  ;;  %1348 = vmatprep.subr.bf16.mxu1 %v1688_v9 }
  0x4a   :  { %1334 = vmatpush1.bf16.msra.mxu0 %v1691_v17  ;;  %383 = vmatprep.mubr.f32.mxu0 %v1615_v0 }
  0x4b   :  { %248 = vmatmul.mubr.f32.vlgmr.msra.gmra.mrb[0].mxu1 %v1615_v0  ;;  %1336 = vmatprep.subr.bf16.mxu0 %v1693_v22 }
  0x4c   :  { %1350 = vmatpush1.bf16.msra.mxu1 %v1691_v17  ;;  %519 = vmatprep.mubr.f32.mxu1 %v1615_v0 }
  0x4d   :  { %1352 = vmatprep.subr.bf16.mxu1 %v1693_v22 }
  0x4e   :  { %1338 = vmatpush1.bf16.msra.mxu0 %v1696_v27 }
  0x4f   :  { %1340 = vmatprep.subr.bf16.mxu0 %v1699_v35 }
  0x50   :  { %1354 = vmatpush1.bf16.msra.mxu1 %v1696_v27 }
  0x51   :  { %1356 = vmatprep.subr.bf16.mxu1 %v1699_v35 }
  0x52   :  { %1342 = vmatpush1.bf16.msra.mxu0 %v1702_v43 }
  0x53   :  { %1344 = vmatprep.subr.bf16.mxu0 %v1705_v44 }
  0x54   :  { %1358 = vmatpush1.bf16.msra.mxu1 %v1702_v43 }
  0x55   :  { %1360 = vmatprep.subr.bf16.mxu1 %v1705_v44 }
  0x56   :  { %1346 = vmatpush1.bf16.msra.mxu0 %v1708_v48 }
  0x57   :  { %1364 = vmatprep.subr.bf16.mxu0 %v1688_v9 }
  0x58   :  { %1362 = vmatpush1.bf16.msra.mxu1 %v1708_v48 }
  0x59   :  { %1380 = vmatprep.subr.bf16.mxu1 %v1688_v9 }
 0x11c   :  { %v172_v60 = vpop.f32.mrb[0].mxu0 }
 0x11d   :  { %v173_v61 = vadd.f32 %v172_v60, %v95_v57  ;;  %v174_v62 = vpop.f32.mrb[1].mxu0 }
 0x11e   :  { %v175_v63 = vadd.f32 %v174_v62, %v99_v58  ;;  %v249_v1 = vpop.f32.mrb[0].mxu1 }
 0x11f   :  { %177 = vst [vmem:[#allocation2] sm:$0xff] %v173_v61  ;;  %v251_v3 = vpop.f32.mrb[1].mxu1 }
 0x120   :  { %178 = vst [vmem:[#allocation2 + $0x8] sm:$0xff] %v175_v63  ;;  %v256_v4 = vcombine.low %v249_v1, %v251_v3 }
 0x122   :  { %v263_v5 = vrot.slane %v256_v4, %v1740_v2 }
 0x124   :  { %v270_v6 = vrot.slane %v263_v5, %v1740_v2 }
 0x127   :  { %v179_v7 = vld [vmem:[#allocation2] ss:$8 sm:$0x3]  ;;  %v316_v34 = vld [vmem:[#allocation2 + $0x1] ss:$8 sm:$0x3] }
 0x128   :  { %v272_v8 = vadd.f32 %v270_v6, %v179_v7  ;;  %v452_v62 = vld [vmem:[#allocation2 + $0x2] ss:$8 sm:$0x3] }
 0x12a   :  { %280 = vrot.lane.b32.xlu0 %v272_v8, %s1617_s3  ;;  %v1284_v10 = vmul.f32 -1.442695, %v272_v8 }
 0x12c   :  { %1452 = vpow2.f32 %v1284_v10 }
 0x136   :  { %v1453_v11 = vpop.eup %1452 }
 0x137   :  { %v276_v12 = vadd.f32 1.0, %v1453_v11 }
 0x139   :  { %1454 = vrcp.f32 %v276_v12 }
 0x143   :  { %v1455_v15 = vpop.eup %1454 }
 0x144   :  { %v286_v16 = vrot.slane %v1455_v15, 1 }
 0x146   :  { %v288_v19 = vmul.f32 0.0, %v286_v16 }
 0x19c   :  { %v281_v13 = vpop.permute.xlu0 %280 }
 0x19d   :  { %v282_v14 = vrot.slane %v281_v13, 1 }
 0x19f   :  { %1456 = vtanh.f32 %v282_v14 }
 0x1a9   :  { %v1457_v18 = vpop.eup %1456 }
 0x1aa   :  { %v289_v20 = vmul.f32 %v1457_v18, %v1455_v15 }
 0x1ac   :  { %v1745_v21 = vadd.f32 %v289_v20, %v288_v19 }
 0x1ae   :  { %1458 = vtanh.f32 %v1745_v21 }
 0x1b8   :  { %v1459_v23 = vpop.eup %1458 }
 0x1b9   :  { %293 = vrot.lane.b32.xlu0 %v1459_v23, %s1617_s3 }
 0x22b   :  { %v294_v24 = vpop.permute.xlu0 %293 }
 0x22c   :  { %v296_v25 = vmul.f32 %v1455_v15, %v294_v24 }
 0x22e   :  { %v301_v26 = vrot.slane %v296_v25, %v1734_v52 }
 0x230   :  { %302 = vrot.lane.b32.xlu1 %v301_v26, %s1617_s3 }
 0x2a2   :  { %v1751_v28 = vpop.permute.xlu1 %302 }
 0x2a3   :  { %1285 = vmatmul.mubr.msk.f32.vlgmr.msra.gmra.mrb[2].mxu0 %vm102_vm0, %v1751_v28 }
 0x2a4   :  { %1366 = vmatpush1.bf16.msra.mxu0 %v1691_v17  ;;  %655 = vmatprep.mubr.f32.mxu0 %v1615_v0 }
 0x2a5   :  { %1368 = vmatprep.subr.bf16.mxu0 %v1693_v22 }
 0x2a8   :  { %1370 = vmatpush1.bf16.msra.mxu0 %v1696_v27 }
 0x2a9   :  { %1372 = vmatprep.subr.bf16.mxu0 %v1699_v35 }
 0x2ac   :  { %1374 = vmatpush1.bf16.msra.mxu0 %v1702_v43 }
 0x2ad   :  { %1376 = vmatprep.subr.bf16.mxu0 %v1705_v44 }
 0x2b0   :  { %1378 = vmatpush1.bf16.msra.mxu0 %v1708_v48 }
 0x2b1   :  { %1396 = vmatprep.subr.bf16.mxu0 %v1688_v9 }
 0x376   :  { %v385_v29 = vpop.f32.mrb[2].mxu0 }
 0x377   :  { %v387_v30 = vpop.f32.mrb[3].mxu0 }
 0x378   :  { %v392_v31 = vcombine.low %v385_v29, %v387_v30  ;;  %v588_v29 = vld [vmem:[#allocation2 + $0x3] ss:$8 sm:$0x3] }
 0x37a   :  { %v399_v32 = vrot.slane %v392_v31, %v1740_v2 }
 0x37c   :  { %v406_v33 = vrot.slane %v399_v32, %v1740_v2 }
 0x37e   :  { %v408_v36 = vadd.f32 %v406_v33, %v316_v34 }
 0x380   :  { %416 = vrot.lane.b32.xlu1 %v408_v36, %s1617_s3  ;;  %v1286_v37 = vmul.f32 -1.442695, %v408_v36 }
 0x382   :  { %1460 = vpow2.f32 %v1286_v37 }
 0x38c   :  { %v1461_v38 = vpop.eup %1460 }
 0x38d   :  { %v412_v39 = vadd.f32 1.0, %v1461_v38 }
 0x38f   :  { %1462 = vrcp.f32 %v412_v39 }
 0x399   :  { %v1463_v42 = vpop.eup %1462 }
 0x39a   :  { %v422_v45 = vrot.slane %v1463_v42, 1 }
 0x39c   :  { %v424_v47 = vmul.f32 %v422_v45, %v1745_v21 }
 0x3f2   :  { %v417_v40 = vpop.permute.xlu1 %416 }
 0x3f3   :  { %v418_v41 = vrot.slane %v417_v40, 1 }
 0x3f5   :  { %1464 = vtanh.f32 %v418_v41 }
 0x3ff   :  { %v1465_v46 = vpop.eup %1464 }
 0x400   :  { %v425_v49 = vmul.f32 %v1465_v46, %v1463_v42 }
 0x402   :  { %v1768_v50 = vadd.f32 %v425_v49, %v424_v47 }
 0x404   :  { %1466 = vtanh.f32 %v1768_v50 }
 0x40e   :  { %v1467_v51 = vpop.eup %1466 }
 0x40f   :  { %429 = vrot.lane.b32.xlu0 %v1467_v51, %s1617_s3 }
 0x481   :  { %v430_v53 = vpop.permute.xlu0 %429 }
 0x482   :  { %v432_v54 = vmul.f32 %v1463_v42, %v430_v53 }
 0x484   :  { %v437_v55 = vrot.slane %v432_v54, %v1734_v52 }
 0x486   :  { %438 = vrot.lane.b32.xlu1 %v437_v55, %s1617_s3 }
 0x4f8   :  { %v1774_v56 = vpop.permute.xlu1 %438 }
 0x4f9   :  { %1287 = vmatmul.mubr.msk.f32.vlgmr.msra.gmra.mrb[2].mxu1 %vm102_vm0, %v1774_v56 }
 0x4fa   :  { %1382 = vmatpush1.bf16.msra.mxu1 %v1691_v17  ;;  %791 = vmatprep.mubr.f32.mxu1 %v1615_v0 }
 0x4fb   :  { %1384 = vmatprep.subr.bf16.mxu1 %v1693_v22 }
 0x4fe   :  { %1386 = vmatpush1.bf16.msra.mxu1 %v1696_v27 }
 0x4ff   :  { %1388 = vmatprep.subr.bf16.mxu1 %v1699_v35 }
 0x502   :  { %1390 = vmatpush1.bf16.msra.mxu1 %v1702_v43 }
 0x503   :  { %1392 = vmatprep.subr.bf16.mxu1 %v1705_v44 }
 0x506   :  { %1394 = vmatpush1.bf16.msra.mxu1 %v1708_v48 }
 0x507   :  { %1412 = vmatprep.subr.bf16.mxu1 %v1688_v9 }
 0x5cc   :  { %v521_v57 = vpop.f32.mrb[2].mxu1 }
 0x5cd   :  { %v523_v58 = vpop.f32.mrb[3].mxu1 }
 0x5ce   :  { %v528_v59 = vcombine.low %v521_v57, %v523_v58  ;;  %v724_v58 = vld [vmem:[#allocation2 + $0x4] ss:$8 sm:$0x3] }
 0x5d0   :  { %v535_v60 = vrot.slane %v528_v59, %v1740_v2 }
 0x5d2   :  { %v542_v61 = vrot.slane %v535_v60, %v1740_v2 }
 0x5d4   :  { %v544_v63 = vadd.f32 %v542_v61, %v452_v62 }
 0x5d6   :  { %552 = vrot.lane.b32.xlu0 %v544_v63, %s1617_s3  ;;  %v1288_v1 = vmul.f32 -1.442695, %v544_v63 }
 0x5d8   :  { %1468 = vpow2.f32 %v1288_v1 }
 0x5e2   :  { %v1469_v3 = vpop.eup %1468 }
 0x5e3   :  { %v548_v4 = vadd.f32 1.0, %v1469_v3 }
 0x5e5   :  { %1470 = vrcp.f32 %v548_v4 }
 0x5ef   :  { %v1471_v7 = vpop.eup %1470 }
 0x5f0   :  { %v558_v8 = vrot.slane %v1471_v7, 1 }
 0x5f2   :  { %v560_v11 = vmul.f32 %v558_v8, %v1768_v50 }
 0x648   :  { %v553_v5 = vpop.permute.xlu0 %552 }
 0x649   :  { %v554_v6 = vrot.slane %v553_v5, 1 }
 0x64b   :  { %1472 = vtanh.f32 %v554_v6 }
 0x655   :  { %v1473_v10 = vpop.eup %1472 }
 0x656   :  { %v561_v12 = vmul.f32 %v1473_v10, %v1471_v7 }
 0x658   :  { %v1791_v13 = vadd.f32 %v561_v12, %v560_v11 }
 0x65a   :  { %1474 = vtanh.f32 %v1791_v13 }
 0x664   :  { %v1475_v14 = vpop.eup %1474 }
 0x665   :  { %565 = vrot.lane.b32.xlu1 %v1475_v14, %s1617_s3 }
 0x6d7   :  { %v566_v15 = vpop.permute.xlu1 %565 }
 0x6d8   :  { %v568_v16 = vmul.f32 %v1471_v7, %v566_v15 }
 0x6da   :  { %v573_v18 = vrot.slane %v568_v16, %v1734_v52 }
 0x6dc   :  { %574 = vrot.lane.b32.xlu0 %v573_v18, %s1617_s3 }
 0x74e   :  { %v1797_v19 = vpop.permute.xlu0 %574 }
 0x74f   :  { %1289 = vmatmul.mubr.msk.f32.vlgmr.msra.gmra.mrb[4].mxu0 %vm102_vm0, %v1797_v19 }
 0x750   :  { %1398 = vmatpush1.bf16.msra.mxu0 %v1691_v17  ;;  %927 = vmatprep.mubr.f32.mxu0 %v1615_v0 }
 0x751   :  { %1400 = vmatprep.subr.bf16.mxu0 %v1693_v22 }
 0x754   :  { %1402 = vmatpush1.bf16.msra.mxu0 %v1696_v27 }
 0x755   :  { %1404 = vmatprep.subr.bf16.mxu0 %v1699_v35 }
 0x758   :  { %1406 = vmatpush1.bf16.msra.mxu0 %v1702_v43 }
 0x759   :  { %1408 = vmatprep.subr.bf16.mxu0 %v1705_v44 }
 0x75c   :  { %1410 = vmatpush1.bf16.msra.mxu0 %v1708_v48 }
 0x75d   :  { %1428 = vmatprep.subr.bf16.mxu0 %v1688_v9 }
 0x822   :  { %v657_v20 = vpop.f32.mrb[4].mxu0 }
 0x823   :  { %v659_v23 = vpop.f32.mrb[5].mxu0 }
 0x824   :  { %v664_v24 = vcombine.low %v657_v20, %v659_v23 }
 0x826   :  { %v671_v25 = vrot.slane %v664_v24, %v1740_v2 }
 0x828   :  { %v678_v26 = vrot.slane %v671_v25, %v1740_v2 }
 0x82a   :  { %v680_v30 = vadd.f32 %v678_v26, %v588_v29 }
 0x82c   :  { %688 = vrot.lane.b32.xlu1 %v680_v30, %s1617_s3  ;;  %v1290_v31 = vmul.f32 -1.442695, %v680_v30 }
 0x82e   :  { %1476 = vpow2.f32 %v1290_v31 }
 0x838   :  { %v1477_v32 = vpop.eup %1476 }
 0x839   :  { %v684_v33 = vadd.f32 1.0, %v1477_v32 }
 0x83b   :  { %1478 = vrcp.f32 %v684_v33 }
 0x845   :  { %v1479_v9 = vpop.eup %1478 }
 0x846   :  { %v694_v37 = vrot.slane %v1479_v9, 1 }
 0x848   :  { %v696_v39 = vmul.f32 %v694_v37, %v1791_v13 }
 0x89e   :  { %v689_v34 = vpop.permute.xlu1 %688 }
 0x89f   :  { %v690_v36 = vrot.slane %v689_v34, 1 }
 0x8a1   :  { %1480 = vtanh.f32 %v690_v36 }
 0x8ab   :  { %v1481_v38 = vpop.eup %1480 }
 0x8ac   :  { %v697_v40 = vmul.f32 %v1481_v38, %v1479_v9 }
 0x8ae   :  { %v1814_v41 = vadd.f32 %v697_v40, %v696_v39 }
 0x8b0   :  { %1482 = vtanh.f32 %v1814_v41 }
 0x8ba   :  { %v1483_v42 = vpop.eup %1482 }
 0x8bb   :  { %701 = vrot.lane.b32.xlu0 %v1483_v42, %s1617_s3 }
 0x92d   :  { %v702_v45 = vpop.permute.xlu0 %701 }
 0x92e   :  { %v704_v46 = vmul.f32 %v1479_v9, %v702_v45  ;;  %v996_v45 = vld [vmem:[#allocation2 + $0x6] ss:$8 sm:$0x3] }
 0x930   :  { %v709_v47 = vrot.slane %v704_v46, %v1734_v52 }
 0x932   :  { %710 = vrot.lane.b32.xlu1 %v709_v47, %s1617_s3 }
 0x9a4   :  { %v1820_v49 = vpop.permute.xlu1 %710 }
 0x9a5   :  { %1291 = vmatmul.mubr.msk.f32.vlgmr.msra.gmra.mrb[4].mxu1 %vm102_vm0, %v1820_v49 }
 0x9a6   :  { %1414 = vmatpush1.bf16.msra.mxu1 %v1691_v17  ;;  %1063 = vmatprep.mubr.f32.mxu1 %v1615_v0 }
 0x9a7   :  { %1416 = vmatprep.subr.bf16.mxu1 %v1693_v22 }
 0x9aa   :  { %1418 = vmatpush1.bf16.msra.mxu1 %v1696_v27 }
 0x9ab   :  { %1420 = vmatprep.subr.bf16.mxu1 %v1699_v35 }
 0x9ae   :  { %1422 = vmatpush1.bf16.msra.mxu1 %v1702_v43 }
 0x9af   :  { %1424 = vmatprep.subr.bf16.mxu1 %v1705_v44 }
 0x9b2   :  { %1426 = vmatpush1.bf16.msra.mxu1 %v1708_v48 }
 0xa78   :  { %v793_v51 = vpop.f32.mrb[4].mxu1 }
 0xa79   :  { %v795_v53 = vpop.f32.mrb[5].mxu1 }
 0xa7a   :  { %v800_v54 = vcombine.low %v793_v51, %v795_v53 }
 0xa7c   :  { %v807_v55 = vrot.slane %v800_v54, %v1740_v2 }
 0xa7e   :  { %v814_v57 = vrot.slane %v807_v55, %v1740_v2 }
 0xa80   :  { %v816_v59 = vadd.f32 %v814_v57, %v724_v58 }
 0xa82   :  { %824 = vrot.lane.b32.xlu0 %v816_v59, %s1617_s3  ;;  %v1292_v60 = vmul.f32 -1.442695, %v816_v59 }
 0xa84   :  { %1484 = vpow2.f32 %v1292_v60 }
 0xa8e   :  { %v1485_v61 = vpop.eup %1484 }
 0xa8f   :  { %v820_v62 = vadd.f32 1.0, %v1485_v61 }
 0xa91   :  { %1486 = vrcp.f32 %v820_v62 }
 0xa9b   :  { %v1487_v3 = vpop.eup %1486 }
 0xa9c   :  { %v830_v4 = vrot.slane %v1487_v3, 1 }
 0xa9e   :  { %v832_v6 = vmul.f32 %v830_v4, %v1814_v41 }
 0xaf4   :  { %v825_v63 = vpop.permute.xlu0 %824 }
 0xaf5   :  { %v826_v1 = vrot.slane %v825_v63, 1 }
 0xaf7   :  { %1488 = vtanh.f32 %v826_v1 }
 0xb01   :  { %v1489_v5 = vpop.eup %1488 }
 0xb02   :  { %v833_v7 = vmul.f32 %v1489_v5, %v1487_v3 }
 0xb04   :  { %v1836_v8 = vadd.f32 %v833_v7, %v832_v6 }
 0xb06   :  { %1490 = vtanh.f32 %v1836_v8 }
 0xb10   :  { %v1491_v10 = vpop.eup %1490 }
 0xb11   :  { %837 = vrot.lane.b32.xlu1 %v1491_v10, %s1617_s3 }
 0xb83   :  { %v838_v11 = vpop.permute.xlu1 %837 }
 0xb84   :  { %v840_v12 = vmul.f32 %v1487_v3, %v838_v11 }
 0xb86   :  { %v845_v14 = vrot.slane %v840_v12, %v1734_v52 }
 0xb88   :  { %846 = vrot.lane.b32.xlu0 %v845_v14, %s1617_s3  ;;  %v1132_v14 = vld [vmem:[#allocation2 + $0x7] ss:$8 sm:$0x3] }
 0xbfa   :  { %v1842_v15 = vpop.permute.xlu0 %846 }
 0xbfb   :  { %1293 = vmatmul.mubr.msk.f32.vlgmr.msra.gmra.mrb[6].mxu0 %vm102_vm0, %v1842_v15 }
 0xbfc   :  { %1430 = vmatpush1.bf16.msra.mxu0 %v1691_v17  ;;  %1199 = vmatprep.mubr.f32.mxu0 %v1615_v0  ;;  %v860_v0 = vld [vmem:[#allocation2 + $0x5] ss:$8 sm:$0x3] }
 0xbfd   :  { %1432 = vmatprep.subr.bf16.mxu0 %v1693_v22 }
 0xc00   :  { %1434 = vmatpush1.bf16.msra.mxu0 %v1696_v27 }
 0xc01   :  { %1436 = vmatprep.subr.bf16.mxu0 %v1699_v35 }
 0xc04   :  { %1438 = vmatpush1.bf16.msra.mxu0 %v1702_v43 }
 0xc05   :  { %1440 = vmatprep.subr.bf16.mxu0 %v1705_v44 }
 0xc08   :  { %1442 = vmatpush1.bf16.msra.mxu0 %v1708_v48 }
 0xcce   :  { %v929_v16 = vpop.f32.mrb[6].mxu0 }
 0xccf   :  { %v931_v18 = vpop.f32.mrb[7].mxu0 }
 0xcd0   :  { %v936_v20 = vcombine.low %v929_v16, %v931_v18  ;;  %v309_v18 = vrot.slane %v1745_v21, %v1734_v52 }
 0xcd2   :  { %v943_v23 = vrot.slane %v936_v20, %v1740_v2  ;;  %v581_v20 = vrot.slane %v1791_v13, %v1734_v52 }
 0xcd4   :  { %v950_v17 = vrot.slane %v943_v23, %v1740_v2  ;;  %v853_v23 = vrot.slane %v1836_v8, %v1734_v52 }
 0xcd6   :  { %v952_v24 = vadd.f32 %v950_v17, %v860_v0 }
 0xcd8   :  { %960 = vrot.lane.b32.xlu1 %v952_v24, %s1617_s3  ;;  %v1294_v22 = vmul.f32 -1.442695, %v952_v24 }
 0xcda   :  { %1492 = vpow2.f32 %v1294_v22 }
 0xce4   :  { %v1493_v27 = vpop.eup %1492 }
 0xce5   :  { %v956_v35 = vadd.f32 1.0, %v1493_v27 }
 0xce7   :  { %1494 = vrcp.f32 %v956_v35 }
 0xcf1   :  { %v1495_v48 = vpop.eup %1494 }
 0xcf2   :  { %v966_v25 = vrot.slane %v1495_v48, 1 }
 0xcf4   :  { %v968_v29 = vmul.f32 %v966_v25, %v1836_v8 }
 0xd4a   :  { %v961_v43 = vpop.permute.xlu1 %960 }
 0xd4b   :  { %v962_v44 = vrot.slane %v961_v43, 1 }
 0xd4d   :  { %1496 = vtanh.f32 %v962_v44 }
 0xd57   :  { %v1497_v26 = vpop.eup %1496 }
 0xd58   :  { %v969_v30 = vmul.f32 %v1497_v26, %v1495_v48 }
 0xd5a   :  { %v1858_v31 = vadd.f32 %v969_v30, %v968_v29 }
 0xd5c   :  { %1498 = vtanh.f32 %v1858_v31 }
 0xd66   :  { %v1499_v32 = vpop.eup %1498 }
 0xd67   :  { %973 = vrot.lane.b32.xlu0 %v1499_v32, %s1617_s3 }
 0xdd9   :  { %v974_v33 = vpop.permute.xlu0 %973 }
 0xdda   :  { %v976_v34 = vmul.f32 %v1495_v48, %v974_v33 }
 0xddc   :  { %v981_v36 = vrot.slane %v976_v34, %v1734_v52 }
 0xdde   :  { %982 = vrot.lane.b32.xlu1 %v981_v36, %s1617_s3  ;;  %v445_v36 = vrot.slane %v1768_v50, %v1734_v52 }
 0xe50   :  { %v1864_v9 = vpop.permute.xlu1 %982 }
 0xe51   :  { %1295 = vmatmul.mubr.msk.f32.vlgmr.msra.gmra.mrb[6].mxu1 %vm102_vm0, %v1864_v9 }
 0xf24   :  { %v1065_v37 = vpop.f32.mrb[6].mxu1 }
 0xf25   :  { %v1067_v38 = vpop.f32.mrb[7].mxu1 }
 0xf26   :  { %v1072_v39 = vcombine.low %v1065_v37, %v1067_v38  ;;  %v989_v37 = vrot.slane %v1858_v31, %v1734_v52 }
 0xf28   :  { %v1079_v40 = vrot.slane %v1072_v39, %v1740_v2 }
 0xf2a   :  { %v1086_v42 = vrot.slane %v1079_v40, %v1740_v2 }
 0xf2c   :  { %v1088_v46 = vadd.f32 %v1086_v42, %v996_v45 }
 0xf2e   :  { %1096 = vrot.lane.b32.xlu0 %v1088_v46, %s1617_s3  ;;  %v1296_v47 = vmul.f32 -1.442695, %v1088_v46 }
 0xf30   :  { %1500 = vpow2.f32 %v1296_v47 }
 0xf3a   :  { %v1501_v51 = vpop.eup %1500 }
 0xf3b   :  { %v1092_v53 = vadd.f32 1.0, %v1501_v51 }
 0xf3d   :  { %1502 = vrcp.f32 %v1092_v53 }
 0xf47   :  { %v1503_v57 = vpop.eup %1502 }
 0xf48   :  { %v1102_v58 = vrot.slane %v1503_v57, 1 }
 0xf4a   :  { %v1104_v60 = vmul.f32 %v1102_v58, %v1858_v31 }
 0xfa0   :  { %v1097_v54 = vpop.permute.xlu0 %1096 }
 0xfa1   :  { %v1098_v55 = vrot.slane %v1097_v54, 1 }
 0xfa3   :  { %1504 = vtanh.f32 %v1098_v55 }
 0xfad   :  { %v1505_v59 = vpop.eup %1504 }
 0xfae   :  { %v1105_v61 = vmul.f32 %v1505_v59, %v1503_v57 }
 0xfb0   :  { %v1106_v62 = vadd.f32 %v1105_v61, %v1104_v60 }
 0xfb2   :  { %1506 = vtanh.f32 %v1106_v62 }
 0xfbc   :  { %v1507_v63 = vpop.eup %1506 }
 0xfbd   :  { %1109 = vrot.lane.b32.xlu1 %v1507_v63, %s1617_s3 }
0x102f   :  { %v1110_v1 = vpop.permute.xlu1 %1109 }
0x1030   :  { %v1112_v3 = vmul.f32 %v1503_v57, %v1110_v1 }
0x1032   :  { %v1117_v4 = vrot.slane %v1112_v3, %v1734_v52 }
0x1034   :  { %1118 = vrot.lane.b32.xlu0 %v1117_v4, %s1617_s3 }
0x10a6   :  { %v1119_v5 = vpop.permute.xlu0 %1118 }
0x10a7   :  { %1297 = vmatmul.mubr.msk.f32.vlgmr.msra.gmra.mrb[8].mxu0 %vm102_vm0, %v1119_v5 }
0x117a   :  { %v1201_v6 = vpop.f32.mrb[8].mxu0 }
0x117b   :  { %v1203_v7 = vpop.f32.mrb[9].mxu0 }
0x117c   :  { %v1208_v10 = vcombine.low %v1201_v6, %v1203_v7 }
0x117e   :  { %v1215_v11 = vrot.slane %v1208_v10, %v1740_v2 }
0x1180   :  { %v1222_v12 = vrot.slane %v1215_v11, %v1740_v2  ;;  %v1125_v2 = vrot.slane %v1106_v62, %v1734_v52 }
0x1182   :  { %v1224_v16 = vadd.f32 %v1222_v12, %v1132_v14 }
0x1184   :  { %1232 = vrot.lane.b32.xlu1 %v1224_v16, %s1617_s3  ;;  %v1298_v17 = vmul.f32 -1.442695, %v1224_v16 }
0x1186   :  { %1508 = vpow2.f32 %v1298_v17 }
0x1188   :  { %310 = vrot.lane.b32.xlu1 %v309_v18, %s1617_s3 }
0x118c   :  { %582 = vrot.lane.b32.xlu1 %v581_v20, %s1617_s3 }
0x1190   :  { %854 = vrot.lane.b32.xlu1 %v853_v23, %s1617_s3  ;;  %v1509_v0 = vpop.eup %1508 }
0x1191   :  { %v1228_v21 = vadd.f32 1.0, %v1509_v0 }
0x1193   :  { %1510 = vrcp.f32 %v1228_v21 }
0x1194   :  { %1126 = vrot.lane.b32.xlu1 %v1125_v2, %s1617_s3 }
0x119d   :  { %v1511_v8 = vpop.eup %1510 }
0x119e   :  { %v1238_v44 = vrot.slane %v1511_v8, 1 }
0x11a0   :  { %v1240_v29 = vmul.f32 %v1238_v44, %v1106_v62 }
0x11f6   :  { %v1233_v24 = vpop.permute.xlu1 %1232 }
0x11f7   :  { %v1234_v22 = vrot.slane %v1233_v24, 1 }
0x11f9   :  { %1512 = vtanh.f32 %v1234_v22 }
0x11fa   :  { %v311_v13 = vpop.permute.xlu1 %310 }
0x11fb   :  { %v313_v27 = vsel %vm102_vm0, %v1751_v28, %v311_v13 }
0x11fc   :  { %314 = vst [vmem:[#allocation9] sm:$0x1] %v313_v27 }
0x11fe   :  { %v583_v35 = vpop.permute.xlu1 %582 }
0x11ff   :  { %v585_v43 = vsel %vm102_vm0, %v1797_v19, %v583_v35 }
0x1200   :  { %586 = vst [vmem:[#allocation9 + $0x2] sm:$0x1] %v585_v43 }
0x1202   :  { %v855_v48 = vpop.permute.xlu1 %854 }
0x1203   :  { %v1513_v25 = vpop.eup %1512  ;;  %v857_v26 = vsel %vm102_vm0, %v1842_v15, %v855_v48  ;;  %v717_v15 = vrot.slane %v1814_v41, %v1734_v52 }
0x1204   :  { %858 = vst [vmem:[#allocation9 + $0x4] sm:$0x1] %v857_v26  ;;  %v1241_v30 = vmul.f32 %v1513_v25, %v1511_v8 }
0x1206   :  { %v1127_v32 = vpop.permute.xlu1 %1126  ;;  %v1242_v33 = vadd.f32 %v1241_v30, %v1240_v29 }
0x1207   :  { %v1129_v28 = vsel %vm102_vm0, %v1119_v5, %v1127_v32 }
0x1208   :  { %1130 = vst [vmem:[#allocation9 + $0x6] sm:$0x1] %v1129_v28  ;;  %v1261_v34 = vrot.slane %v1242_v33, %v1734_v52  ;;  %1514 = vtanh.f32 %v1242_v33 }
0x120a   :  { %1262 = vrot.lane.b32.xlu1 %v1261_v34, %s1617_s3 }
0x1212   :  { %v1515_v19 = vpop.eup %1514 }
0x1213   :  { %1245 = vrot.lane.b32.xlu0 %v1515_v19, %s1617_s3 }
0x1217   :  { %446 = vrot.lane.b32.xlu0 %v445_v36, %s1617_s3 }
0x121b   :  { %718 = vrot.lane.b32.xlu0 %v717_v15, %s1617_s3 }
0x121f   :  { %990 = vrot.lane.b32.xlu0 %v989_v37, %s1617_s3 }
0x1285   :  { %v1246_v38 = vpop.permute.xlu0 %1245 }
0x1286   :  { %v1248_v39 = vmul.f32 %v1511_v8, %v1246_v38 }
0x1288   :  { %v1253_v40 = vrot.slane %v1248_v39, %v1734_v52  ;;  %v1263_v52 = vpop.permute.xlu1 %1262 }
0x1289   :  { %v447_v42 = vpop.permute.xlu0 %446 }
0x128a   :  { %v449_v50 = vsel %vm102_vm0, %v1774_v56, %v447_v42  ;;  %1254 = vrot.lane.b32.xlu0 %v1253_v40, %s1617_s3 }
0x128b   :  { %450 = vst [vmem:[#allocation9 + $0x1] sm:$0x1] %v449_v50 }
0x128d   :  { %v719_v45 = vpop.permute.xlu0 %718 }
0x128e   :  { %v721_v41 = vsel %vm102_vm0, %v1820_v49, %v719_v45 }
0x128f   :  { %722 = vst [vmem:[#allocation9 + $0x3] sm:$0x1] %v721_v41 }
0x1291   :  { %v991_v46 = vpop.permute.xlu0 %990 }
0x1292   :  { %v993_v31 = vsel %vm102_vm0, %v1864_v9, %v991_v46 }
0x1293   :  { %994 = vst [vmem:[#allocation9 + $0x5] sm:$0x1] %v993_v31 }
0x12fc   :  { %v1255_v47 = vpop.permute.xlu0 %1254 }
0x12fd   :  { %v1265_v56 = vsel %vm102_vm0, %v1255_v47, %v1263_v52 }
0x12fe   :  { %1266 = vst [vmem:[#allocation9 + $0x7] sm:$0x1] %v1265_v56 }
0x12ff   :  { %1593 = shalt.err (!%p1590_p0)
}
0x1300   :  { %s1594_s5 = scalar_lea.hbm %s1934_s4, 128 }
0x1301   :  { %p1595_p1 = scmp.ne.s32.totalorder %s1934_s4, %s1594_s5  ;;  %p1598_p2 = scmp.lt.u32.totalorder %s1594_s5, %s1934_s4 }
0x1303   :  { %p1600_p3 = pnand %p1598_p2, %p1595_p1 }
0x1305   :  { %1603 = shalt.err (!%p1600_p3)
}
0x1306   :  { %1276 = dma.vmem_to_hbm [thread:$0]  %s1274_s27, 128, %s1934_s4, [#allocation5]  }
0x1307   :  { %1608 = dma.done.wait [#allocation5], 128  }
0x1308   :  { %1609 = vsyncadd [#allocation5], 4294967168 }
0x1309   :  { %1280 = vsyncpa [#allocation4], 1 }
0x130a   :  { %1281 = vsyncpa [#allocation7], 1 }
0x130b   :  { %1282 = vsyncpa [#allocation5], 1 }

</bundles_post_ra>
